<compile_context>
chip_gen: v7x
topology: tpu7x:2x2x1
jax: 0.10.0
libtpu: 0.0.40
codegen_flags: <defaults>
</compile_context>

<pallas_src>
import functools

import jax
import jax.numpy as jnp
from jax import lax
from jax.experimental import pallas as pl
from jax.experimental.pallas import tpu as pltpu

LOSS_COEF = 100.0
EPS = 1e-8


def bigsleep_kernel(normu_ref, cls_ref, text_ref, img_ref,
                    classes_ref, loss_ref, *, c_actual):
    normu = normu_ref[...].astype(jnp.float32)          # (N, D)
    cls = cls_ref[...].astype(jnp.float32)              # (N, Cp), Cp % 128 == 0
    text = text_ref[...].astype(jnp.float32)            # (1, E)
    img = img_ref[...].astype(jnp.float32)              # (M, E)

    N, D = normu.shape
    M = img.shape[0]

    # ---- Latents forward: classes = sigmoid(cls) (max_classes=None path) ----
    # tanh form: exact sigmoid, one EUP op + one FMA (no exp + add + divide).
    classes = 0.5 * jnp.tanh(0.5 * cls) + 0.5
    classes_ref[...] = classes.astype(classes_ref.dtype)

    # ---- cls_loss: ((50 * topk(classes, k=999, largest=False))**2).mean() ----
    # smallest 999 of 1000 per row == all entries except the per-row maximum.
    # Done immediately after the sigmoid so the 32-vreg `classes` value goes
    # dead before the lat_loss section (less vreg pressure / spilling).
    # Padded columns hold sigmoid(-30) ~ 1e-13: negligible in both reductions.
    row_max = jnp.max(classes, axis=1, keepdims=True)                    # (N,1)
    row_sq = jnp.sum(classes * classes, axis=1, keepdims=True)           # (N,1)
    sq_all = jnp.sum(row_sq, axis=0, keepdims=True)                      # (1,1)
    sq_max = jnp.sum(row_max * row_max, axis=0, keepdims=True)           # (1,1)
    cls_loss = (2500.0 * (sq_all - sq_max)) / (N * (c_actual - 1))

    # ---- lat_loss ----
    # Single pass over normu: per-row sum and sum-of-squares, reused everywhere.
    row_sum = jnp.sum(normu, axis=1, keepdims=True)                      # (N,1)
    row_sumsq = jnp.sum(normu * normu, axis=1, keepdims=True)            # (N,1)
    row_mean = row_sum / D

    # |1 - std(latents, dim=1)|.mean()   (torch.std default: unbiased, ddof=1)
    # NOTE: sumsq - sum^2/D has a cancellation risk when mean^2 ~ E[x^2]; with
    # N(0,1) latents and the 1e-4 tolerance this is safe (clamped at 0).
    var_unb = jnp.maximum(row_sumsq - row_sum * row_mean, 0.0) / (D - 1)
    std_row = jnp.sqrt(var_unb)
    term1 = jnp.sum(jnp.abs(1.0 - std_row), axis=0, keepdims=True) / N   # (1,1)

    # |mean(latents)|
    total_sum = jnp.sum(row_sum, axis=0, keepdims=True)                  # (1,1)
    term2 = jnp.abs(total_sum / (N * D))

    # 4 * max(mean(latents^2), thresh_lat=1)
    mean_sq = jnp.sum(row_sumsq, axis=0, keepdims=True) / (N * D)
    term3 = 4.0 * jnp.maximum(mean_sq, 1.0)

    # skew / kurtosis of the LAST latent row only (python-loop leakage in the
    # reference: the loop overwrites `skews`/`kurtoses`, only the last sticks).
    last = normu[N - 1:N, :]                                             # (1, D)
    lsum = row_sum[N - 1:N, :]
    lsumsq = row_sumsq[N - 1:N, :]
    lmean = lsum / D
    lvar = jnp.maximum(lsumsq - lsum * lmean, 0.0) / D                   # biased var
    lstd = jnp.sqrt(lvar)
    ld = last - lmean
    ld2 = ld * ld
    sum3 = jnp.sum(ld2 * ld, axis=1, keepdims=True)                      # (1,1)
    sum4 = jnp.sum(ld2 * ld2, axis=1, keepdims=True)                     # (1,1)
    # divide by std^3 / std^4 after the reductions: two clamped scalar divides
    skew = (sum3 / D) / jnp.maximum(lvar * lstd, EPS)
    kurt = (sum4 / D) / jnp.maximum(lvar * lvar, EPS) - 3.0

    lat_loss = term1 + term2 + term3 + jnp.abs(kurt) / N + jnp.abs(skew) / N

    # ---- sim_loss: -loss_coef * mean(cosine_similarity(text, image, dim=-1)) ----
    # TODO(synk): at production sizes (128 cutouts x 512-d embeds) move `dots`
    # to the MXU via jnp.dot(img, text.T); the VPU path is cheaper at toy sizes.
    dots = jnp.sum(text * img, axis=1, keepdims=True)                    # (M,1)
    tnorm_sq = jnp.sum(text * text, axis=1, keepdims=True)               # (1,1)
    inorm_sq = jnp.sum(img * img, axis=1, keepdims=True)                 # (M,1)
    denom = jnp.sqrt(inorm_sq * tnorm_sq)                                # (M,1)
    cos = dots / jnp.maximum(denom, EPS)
    sim_loss = -LOSS_COEF * (jnp.sum(cos, axis=0, keepdims=True) / M)

    # ---- pack the three scalar losses into one lane-dense output write ----
    lane = lax.broadcasted_iota(jnp.int32, (1, 128), 1)
    loss_vec = (jnp.where(lane == 0, lat_loss, 0.0)
                + jnp.where(lane == 1, cls_loss, 0.0)
                + jnp.where(lane == 2, sim_loss, 0.0))
    loss_ref[...] = loss_vec.astype(loss_ref.dtype)


def bigsleep_forward(normu, cls, text_embed, image_embed):
    N, D = normu.shape
    C = cls.shape[1]
    M, E = image_embed.shape

    # Pad the class axis to a multiple of 128: the (N, C) classes store is the
    # biggest store in the kernel and becomes unmasked/lane-dense; the pad
    # value -30 drives sigmoid to ~1e-13 so reductions are unaffected.
    C_pad = pl.cdiv(C, 128) * 128
    if C_pad != C:
        cls_in = jnp.pad(cls, ((0, 0), (0, C_pad - C)), constant_values=-30.0)
    else:
        cls_in = cls

    vmem = pltpu.MemorySpace.VMEM
    out_shapes = (
        jax.ShapeDtypeStruct((N, C_pad), jnp.float32),   # soft_one_hot_classes (padded)
        jax.ShapeDtypeStruct((1, 128), jnp.float32),     # [lat_loss, cls_loss, sim_loss, ...]
    )

    # Tiny advisory estimate so XLA schedules this micro-kernel aggressively
    # among the surrounding (external) BigGAN / CLIP ops.
    flops = 6 * N * C_pad + 14 * N * D + 6 * M * E + 128
    transcendentals = N * C_pad + 2 * N + M + 4
    bytes_accessed = 4 * (N * D + 2 * N * C_pad + E + M * E + 128)

    # TODO(synk): at production sizes, add a 1-D "parallel" grid over the
    # latent/cutout axis for v7x's 2 TensorCores; pure overhead at toy sizes.
    classes_p, losses = pl.pallas_call(
        functools.partial(bigsleep_kernel, c_actual=C),
        out_shape=out_shapes,
        in_specs=[pl.BlockSpec(memory_space=vmem)] * 4,
        out_specs=tuple(pl.BlockSpec(memory_space=vmem) for _ in out_shapes),
        cost_estimate=pl.CostEstimate(flops=flops,
                                      transcendentals=transcendentals,
                                      bytes_accessed=bytes_accessed),
    )(normu, cls_in, text_embed, image_embed)

    classes = classes_p[:, :C]
    return classes, losses[0, 0], losses[0, 1], losses[0, 2]


if __name__ == "__main__":
    key = jax.random.PRNGKey(0)
    k1, k2, k3, k4 = jax.random.split(key, 4)

    num_latents = 32      # Latents.num_latents
    latent_dim = 128      # Latents.normu second dim
    num_classes = 1000    # Latents.cls second dim
    num_cutouts = 8       # small stand-in for 128 cutouts
    embed_dim = 32        # small stand-in for CLIP's 512-d embeddings

    # Latents.__init__ parameters, deterministic init (normu ~ N(0,1), cls ~ N(-3.9,0.3))
    normu = jax.random.normal(k1, (num_latents, latent_dim), jnp.float32)
    cls = -3.9 + 0.3 * jax.random.normal(k2, (num_latents, num_classes), jnp.float32)

    # TODO(synk): BigGAN generator, random cutout/interpolate sampling and the CLIP
    # perceptor are external pretrained models; the embeddings below are deterministic
    # synthetic stand-ins for the cosine-similarity loss term.
    text_embed = jax.random.normal(k3, (1, embed_dim), jnp.float32)
    image_embed = jax.random.normal(k4, (num_cutouts, embed_dim), jnp.float32)

    classes, lat_loss, cls_loss, sim_loss = jax.block_until_ready(
        bigsleep_forward(normu, cls, text_embed, image_embed))

    # ---- plain-JAX reference for correctness ----
    ref_classes = jax.nn.sigmoid(cls)
    std = jnp.std(normu, axis=1, ddof=1)
    ref_lat = (jnp.mean(jnp.abs(1.0 - std))
               + jnp.abs(jnp.mean(normu))
               + 4.0 * jnp.maximum(jnp.mean(normu ** 2), 1.0))
    last = normu[-1]
    ld = last - jnp.mean(last)
    zr = ld / jnp.sqrt(jnp.mean(ld ** 2))
    ref_lat = (ref_lat
               + jnp.abs(jnp.mean(zr ** 4) - 3.0) / num_latents
               + jnp.abs(jnp.mean(zr ** 3)) / num_latents)
    smallest999 = jnp.sort(ref_classes, axis=1)[:, :num_classes - 1]
    ref_cls = jnp.mean((50.0 * smallest999) ** 2)
    ref_cos = (jnp.sum(text_embed * image_embed, axis=-1)
               / jnp.maximum(jnp.linalg.norm(text_embed, axis=-1)
                             * jnp.linalg.norm(image_embed, axis=-1), EPS))
    ref_sim = -LOSS_COEF * jnp.mean(ref_cos)

    assert jnp.allclose(classes, ref_classes, rtol=1e-5, atol=1e-5)
    assert jnp.allclose(lat_loss, ref_lat, rtol=1e-4, atol=1e-4)
    assert jnp.allclose(cls_loss, ref_cls, rtol=1e-4, atol=1e-4)
    assert jnp.allclose(sim_loss, ref_sim, rtol=1e-4, atol=1e-4)

    print("KERNEL_OK")
</pallas_src>

<mosaic_0001>
module attributes {stable_mosaic.version = 11 : i64} {
  func.func @bigsleep_kernel(%arg0: memref<32x128xf32, #tpu.memory_space<vmem>>, %arg1: memref<32x1024xf32, #tpu.memory_space<vmem>>, %arg2: memref<1x32xf32, #tpu.memory_space<vmem>>, %arg3: memref<8x32xf32, #tpu.memory_space<vmem>>, %arg4: memref<32x1024xf32, #tpu.memory_space<vmem>>, %arg5: memref<1x128xf32, #tpu.memory_space<vmem>>) attributes {dimension_semantics = [], scalar_prefetch = 0 : i64, scratch_operands = 0 : i64, tpu.core_type = #tpu.core_type<tc>} {
    %c0 = arith.constant 0 : index
    %c0_0 = arith.constant 0 : index
    %0 = vector.load %arg0[%c0, %c0_0] : memref<32x128xf32, #tpu.memory_space<vmem>>, vector<32x128xf32>
    %c0_1 = arith.constant 0 : index
    %c0_2 = arith.constant 0 : index
    %1 = vector.load %arg1[%c0_1, %c0_2] : memref<32x1024xf32, #tpu.memory_space<vmem>>, vector<32x1024xf32>
    %c0_3 = arith.constant 0 : index
    %c0_4 = arith.constant 0 : index
    %2 = vector.load %arg2[%c0_3, %c0_4] : memref<1x32xf32, #tpu.memory_space<vmem>>, vector<1x32xf32>
    %c0_5 = arith.constant 0 : index
    %c0_6 = arith.constant 0 : index
    %3 = vector.load %arg3[%c0_5, %c0_6] : memref<8x32xf32, #tpu.memory_space<vmem>>, vector<8x32xf32>
    %cst = arith.constant 5.000000e-01 : f32
    %4 = vector.broadcast %cst : f32 to vector<32x1024xf32>
    %5 = arith.mulf %4, %1 : vector<32x1024xf32>
    %6 = math.tanh %5 : vector<32x1024xf32>
    %cst_7 = arith.constant 5.000000e-01 : f32
    %7 = vector.broadcast %cst_7 : f32 to vector<32x1024xf32>
    %8 = arith.mulf %7, %6 : vector<32x1024xf32>
    %cst_8 = arith.constant 5.000000e-01 : f32
    %9 = vector.broadcast %cst_8 : f32 to vector<32x1024xf32>
    %10 = arith.addf %8, %9 : vector<32x1024xf32>
    %c0_9 = arith.constant 0 : index
    %c0_10 = arith.constant 0 : index
    %11 = vector.load %arg4[%c0_9, %c0_10] : memref<32x1024xf32, #tpu.memory_space<vmem>>, vector<32x1024xf32>
    tpu.vector_store %arg4[%c0_9, %c0_10], %10 {strides = array<i32>} : memref<32x1024xf32, #tpu.memory_space<vmem>>, vector<32x1024xf32>,
    %cst_11 = arith.constant dense<0xFF800000> : vector<32xf32>
    %12 = vector.multi_reduction <maximumf>, %10, %cst_11 [1] : vector<32x1024xf32> to vector<32xf32>
    %13 = vector.shape_cast %12 : vector<32xf32> to vector<32x1xf32>
    %14 = arith.mulf %10, %10 : vector<32x1024xf32>
    %cst_12 = arith.constant dense<0.000000e+00> : vector<32xf32>
    %15 = vector.multi_reduction <add>, %14, %cst_12 [1] : vector<32x1024xf32> to vector<32xf32>
    %16 = vector.shape_cast %15 : vector<32xf32> to vector<32x1xf32>
    %cst_13 = arith.constant dense<0.000000e+00> : vector<1xf32>
    %17 = vector.multi_reduction <add>, %16, %cst_13 [0] : vector<32x1xf32> to vector<1xf32>
    %18 = vector.shape_cast %17 : vector<1xf32> to vector<1x1xf32>
    %19 = arith.mulf %13, %13 : vector<32x1xf32>
    %cst_14 = arith.constant dense<0.000000e+00> : vector<1xf32>
    %20 = vector.multi_reduction <add>, %19, %cst_14 [0] : vector<32x1xf32> to vector<1xf32>
    %21 = vector.shape_cast %20 : vector<1xf32> to vector<1x1xf32>
    %22 = arith.subf %18, %21 : vector<1x1xf32>
    %cst_15 = arith.constant 2.500000e+03 : f32
    %23 = vector.broadcast %cst_15 : f32 to vector<1x1xf32>
    %24 = arith.mulf %23, %22 : vector<1x1xf32>
    %cst_16 = arith.constant 3.196800e+04 : f32
    %25 = vector.broadcast %cst_16 : f32 to vector<1x1xf32>
    %26 = arith.divf %24, %25 : vector<1x1xf32>
    %cst_17 = arith.constant dense<0.000000e+00> : vector<32xf32>
    %27 = vector.multi_reduction <add>, %0, %cst_17 [1] : vector<32x128xf32> to vector<32xf32>
    %28 = vector.shape_cast %27 : vector<32xf32> to vector<32x1xf32>
    %29 = arith.mulf %0, %0 : vector<32x128xf32>
    %cst_18 = arith.constant dense<0.000000e+00> : vector<32xf32>
    %30 = vector.multi_reduction <add>, %29, %cst_18 [1] : vector<32x128xf32> to vector<32xf32>
    %31 = vector.shape_cast %30 : vector<32xf32> to vector<32x1xf32>
    %cst_19 = arith.constant 1.280000e+02 : f32
    %32 = vector.broadcast %cst_19 : f32 to vector<32x1xf32>
    %33 = arith.divf %28, %32 : vector<32x1xf32>
    %34 = arith.mulf %28, %33 : vector<32x1xf32>
    %35 = arith.subf %31, %34 : vector<32x1xf32>
    %cst_20 = arith.constant 0.000000e+00 : f32
    %36 = vector.broadcast %cst_20 : f32 to vector<32x1xf32>
    %37 = arith.maximumf %35, %36 : vector<32x1xf32>
    %cst_21 = arith.constant 1.270000e+02 : f32
    %38 = vector.broadcast %cst_21 : f32 to vector<32x1xf32>
    %39 = arith.divf %37, %38 : vector<32x1xf32>
    %40 = math.sqrt %39 : vector<32x1xf32>
    %cst_22 = arith.constant 1.000000e+00 : f32
    %41 = vector.broadcast %cst_22 : f32 to vector<32x1xf32>
    %42 = arith.subf %41, %40 : vector<32x1xf32>
    %43 = math.absf %42 : vector<32x1xf32>
    %cst_23 = arith.constant dense<0.000000e+00> : vector<1xf32>
    %44 = vector.multi_reduction <add>, %43, %cst_23 [0] : vector<32x1xf32> to vector<1xf32>
    %45 = vector.shape_cast %44 : vector<1xf32> to vector<1x1xf32>
    %cst_24 = arith.constant 3.200000e+01 : f32
    %46 = vector.broadcast %cst_24 : f32 to vector<1x1xf32>
    %47 = arith.divf %45, %46 : vector<1x1xf32>
    %cst_25 = arith.constant dense<0.000000e+00> : vector<1xf32>
    %48 = vector.multi_reduction <add>, %28, %cst_25 [0] : vector<32x1xf32> to vector<1xf32>
    %49 = vector.shape_cast %48 : vector<1xf32> to vector<1x1xf32>
    %cst_26 = arith.constant 4.096000e+03 : f32
    %50 = vector.broadcast %cst_26 : f32 to vector<1x1xf32>
    %51 = arith.divf %49, %50 : vector<1x1xf32>
    %52 = math.absf %51 : vector<1x1xf32>
    %cst_27 = arith.constant dense<0.000000e+00> : vector<1xf32>
    %53 = vector.multi_reduction <add>, %31, %cst_27 [0] : vector<32x1xf32> to vector<1xf32>
    %54 = vector.shape_cast %53 : vector<1xf32> to vector<1x1xf32>
    %cst_28 = arith.constant 4.096000e+03 : f32
    %55 = vector.broadcast %cst_28 : f32 to vector<1x1xf32>
    %56 = arith.divf %54, %55 : vector<1x1xf32>
    %cst_29 = arith.constant 1.000000e+00 : f32
    %57 = vector.broadcast %cst_29 : f32 to vector<1x1xf32>
    %58 = arith.maximumf %56, %57 : vector<1x1xf32>
    %cst_30 = arith.constant 4.000000e+00 : f32
    %59 = vector.broadcast %cst_30 : f32 to vector<1x1xf32>
    %60 = arith.mulf %59, %58 : vector<1x1xf32>
    %61 = vector.extract_strided_slice %0 {offsets = [31, 0], sizes = [1, 128], strides = [1, 1]} : vector<32x128xf32> to vector<1x128xf32>
    %62 = vector.extract_strided_slice %28 {offsets = [31, 0], sizes = [1, 1], strides = [1, 1]} : vector<32x1xf32> to vector<1x1xf32>
    %63 = vector.extract_strided_slice %31 {offsets = [31, 0], sizes = [1, 1], strides = [1, 1]} : vector<32x1xf32> to vector<1x1xf32>
    %cst_31 = arith.constant 1.280000e+02 : f32
    %64 = vector.broadcast %cst_31 : f32 to vector<1x1xf32>
    %65 = arith.divf %62, %64 : vector<1x1xf32>
    %66 = arith.mulf %62, %65 : vector<1x1xf32>
    %67 = arith.subf %63, %66 : vector<1x1xf32>
    %cst_32 = arith.constant 0.000000e+00 : f32
    %68 = vector.broadcast %cst_32 : f32 to vector<1x1xf32>
    %69 = arith.maximumf %67, %68 : vector<1x1xf32>
    %cst_33 = arith.constant 1.280000e+02 : f32
    %70 = vector.broadcast %cst_33 : f32 to vector<1x1xf32>
    %71 = arith.divf %69, %70 : vector<1x1xf32>
    %72 = math.sqrt %71 : vector<1x1xf32>
    %73 = vector.broadcast %65 : vector<1x1xf32> to vector<1x128xf32>
    %74 = arith.subf %61, %73 : vector<1x128xf32>
    %75 = arith.mulf %74, %74 : vector<1x128xf32>
    %76 = arith.mulf %75, %74 : vector<1x128xf32>
    %cst_34 = arith.constant dense<0.000000e+00> : vector<1xf32>
    %77 = vector.multi_reduction <add>, %76, %cst_34 [1] : vector<1x128xf32> to vector<1xf32>
    %78 = vector.shape_cast %77 : vector<1xf32> to vector<1x1xf32>
    %79 = arith.mulf %75, %75 : vector<1x128xf32>
    %cst_35 = arith.constant dense<0.000000e+00> : vector<1xf32>
    %80 = vector.multi_reduction <add>, %79, %cst_35 [1] : vector<1x128xf32> to vector<1xf32>
    %81 = vector.shape_cast %80 : vector<1xf32> to vector<1x1xf32>
    %cst_36 = arith.constant 1.280000e+02 : f32
    %82 = vector.broadcast %cst_36 : f32 to vector<1x1xf32>
    %83 = arith.divf %78, %82 : vector<1x1xf32>
    %84 = arith.mulf %71, %72 : vector<1x1xf32>
    %cst_37 = arith.constant 9.99999993E-9 : f32
    %85 = vector.broadcast %cst_37 : f32 to vector<1x1xf32>
    %86 = arith.maximumf %84, %85 : vector<1x1xf32>
    %87 = arith.divf %83, %86 : vector<1x1xf32>
    %cst_38 = arith.constant 1.280000e+02 : f32
    %88 = vector.broadcast %cst_38 : f32 to vector<1x1xf32>
    %89 = arith.divf %81, %88 : vector<1x1xf32>
    %90 = arith.mulf %71, %71 : vector<1x1xf32>
    %cst_39 = arith.constant 9.99999993E-9 : f32
    %91 = vector.broadcast %cst_39 : f32 to vector<1x1xf32>
    %92 = arith.maximumf %90, %91 : vector<1x1xf32>
    %93 = arith.divf %89, %92 : vector<1x1xf32>
    %cst_40 = arith.constant 3.000000e+00 : f32
    %94 = vector.broadcast %cst_40 : f32 to vector<1x1xf32>
    %95 = arith.subf %93, %94 : vector<1x1xf32>
    %96 = arith.addf %47, %52 : vector<1x1xf32>
    %97 = arith.addf %96, %60 : vector<1x1xf32>
    %98 = math.absf %95 : vector<1x1xf32>
    %cst_41 = arith.constant 3.200000e+01 : f32
    %99 = vector.broadcast %cst_41 : f32 to vector<1x1xf32>
    %100 = arith.divf %98, %99 : vector<1x1xf32>
    %101 = arith.addf %97, %100 : vector<1x1xf32>
    %102 = math.absf %87 : vector<1x1xf32>
    %cst_42 = arith.constant 3.200000e+01 : f32
    %103 = vector.broadcast %cst_42 : f32 to vector<1x1xf32>
    %104 = arith.divf %102, %103 : vector<1x1xf32>
    %105 = arith.addf %101, %104 : vector<1x1xf32>
    %106 = vector.broadcast %2 : vector<1x32xf32> to vector<8x32xf32>
    %107 = arith.mulf %106, %3 : vector<8x32xf32>
    %cst_43 = arith.constant dense<0.000000e+00> : vector<8xf32>
    %108 = vector.multi_reduction <add>, %107, %cst_43 [1] : vector<8x32xf32> to vector<8xf32>
    %109 = vector.shape_cast %108 : vector<8xf32> to vector<8x1xf32>
    %110 = arith.mulf %2, %2 : vector<1x32xf32>
    %cst_44 = arith.constant dense<0.000000e+00> : vector<1xf32>
    %111 = vector.multi_reduction <add>, %110, %cst_44 [1] : vector<1x32xf32> to vector<1xf32>
    %112 = vector.shape_cast %111 : vector<1xf32> to vector<1x1xf32>
    %113 = arith.mulf %3, %3 : vector<8x32xf32>
    %cst_45 = arith.constant dense<0.000000e+00> : vector<8xf32>
    %114 = vector.multi_reduction <add>, %113, %cst_45 [1] : vector<8x32xf32> to vector<8xf32>
    %115 = vector.shape_cast %114 : vector<8xf32> to vector<8x1xf32>
    %116 = vector.broadcast %112 : vector<1x1xf32> to vector<8x1xf32>
    %117 = arith.mulf %115, %116 : vector<8x1xf32>
    %118 = math.sqrt %117 : vector<8x1xf32>
    %cst_46 = arith.constant 9.99999993E-9 : f32
    %119 = vector.broadcast %cst_46 : f32 to vector<8x1xf32>
    %120 = arith.maximumf %118, %119 : vector<8x1xf32>
    %121 = arith.divf %109, %120 : vector<8x1xf32>
    %cst_47 = arith.constant dense<0.000000e+00> : vector<1xf32>
    %122 = vector.multi_reduction <add>, %121, %cst_47 [0] : vector<8x1xf32> to vector<1xf32>
    %123 = vector.shape_cast %122 : vector<1xf32> to vector<1x1xf32>
    %cst_48 = arith.constant 8.000000e+00 : f32
    %124 = vector.broadcast %cst_48 : f32 to vector<1x1xf32>
    %125 = arith.divf %123, %124 : vector<1x1xf32>
    %cst_49 = arith.constant -1.000000e+02 : f32
    %126 = vector.broadcast %cst_49 : f32 to vector<1x1xf32>
    %127 = arith.mulf %126, %125 : vector<1x1xf32>
    %128 = tpu.iota {dimensions = array<i32: 1>} : vector<1x128xi32>
    %c0_i32 = arith.constant 0 : i32
    %129 = vector.broadcast %c0_i32 : i32 to vector<1x128xi32>
    %130 = arith.cmpi eq, %128, %129 : vector<1x128xi32>
    %cst_50 = arith.constant 0.000000e+00 : f32
    %131 = vector.shape_cast %105 : vector<1x1xf32> to vector<1x1xf32>
    %132 = vector.broadcast %131 : vector<1x1xf32> to vector<1x128xf32>
    %133 = vector.broadcast %cst_50 : f32 to vector<1x128xf32>
    %134 = arith.select %130, %132, %133 : vector<1x128xi1>, vector<1x128xf32>
    %c1_i32 = arith.constant 1 : i32
    %135 = vector.broadcast %c1_i32 : i32 to vector<1x128xi32>
    %136 = arith.cmpi eq, %128, %135 : vector<1x128xi32>
    %cst_51 = arith.constant 0.000000e+00 : f32
    %137 = vector.shape_cast %26 : vector<1x1xf32> to vector<1x1xf32>
    %138 = vector.broadcast %137 : vector<1x1xf32> to vector<1x128xf32>
    %139 = vector.broadcast %cst_51 : f32 to vector<1x128xf32>
    %140 = arith.select %136, %138, %139 : vector<1x128xi1>, vector<1x128xf32>
    %141 = arith.addf %134, %140 : vector<1x128xf32>
    %c2_i32 = arith.constant 2 : i32
    %142 = vector.broadcast %c2_i32 : i32 to vector<1x128xi32>
    %143 = arith.cmpi eq, %128, %142 : vector<1x128xi32>
    %cst_52 = arith.constant 0.000000e+00 : f32
    %144 = vector.shape_cast %127 : vector<1x1xf32> to vector<1x1xf32>
    %145 = vector.broadcast %144 : vector<1x1xf32> to vector<1x128xf32>
    %146 = vector.broadcast %cst_52 : f32 to vector<1x128xf32>
    %147 = arith.select %143, %145, %146 : vector<1x128xi1>, vector<1x128xf32>
    %148 = arith.addf %141, %147 : vector<1x128xf32>
    %c0_53 = arith.constant 0 : index
    %c0_54 = arith.constant 0 : index
    %149 = vector.load %arg5[%c0_53, %c0_54] : memref<1x128xf32, #tpu.memory_space<vmem>>, vector<1x128xf32>
    tpu.vector_store %arg5[%c0_53, %c0_54], %148 {strides = array<i32>} : memref<1x128xf32, #tpu.memory_space<vmem>>, vector<1x128xf32>,
    return
  }
}

</mosaic_0001>

<bundles_post_ra>
// kernel: tpu_custom_call.1
= control target key start
LH: loop header
LB: loop body
LE: loop exit
PB: predicated region body
PF: predicated region fallthrough
CT: control target
= control target key end

     0   :  { %11 = vsyncpa [#allocation3], 0  ;;  %s1093_s0 = inlined_call_operand.hbm [shape: f32[32,128], index: 0, kind: input, shape index: {}]   ;;  %s1094_s1 = inlined_call_operand.hbm [shape: f32[32,1024], index: 1, kind: input, shape index: {}]   ;;  %s1095_s2 = inlined_call_operand.vmem [shape: f32[1,32], index: 2, kind: input, shape index: {}]   ;;  %s1096_s3 = inlined_call_operand.vmem [shape: f32[8,32], index: 3, kind: input, shape index: {}]   ;;  %s1097_s4 = inlined_call_operand.hbm [shape: f32[32,1024], index: 4, kind: output, shape index: {0}]   ;;  %s1098_s5 = inlined_call_operand.hbm [shape: f32[1,128], index: 5, kind: output, shape index: {1}]  }
   0x1   :  { %12 = vsyncpa [#allocation6], 0 }
   0x2   :  { %13 = vsyncpa [#allocation4], 0 }
   0x3   :  { %14 = vsyncpa [#allocation9], 0  ;;  %s802_s18 = smov [#allocation2]   ;;  %s706_s22 = scalar_lea.hbm %s1093_s0, 512 }
   0x4   :  { %s20_s19 = sshll.u32 %s802_s18, 4  ;;  %p707_p0 = scmp.ne.s32.totalorder %s1093_s0, %s706_s22  ;;  %s21_s19 = int_to_ptr.vmem [resolvable:$true] %s20_s19 }
   0x5   :  { %p710_p1 = scmp.lt.u32.totalorder %s706_s22, %s1093_s0 }
   0x7   :  { %p712_p2 = pnand %p710_p1, %p707_p0 }
   0x9   :  { %715 = shalt.err (!%p712_p2)
}
   0xa   :  { %s716_s27 = scalar_lea.vmem %s21_s19, 512  ;;  %p721_p4 = scmp.lt.s32.totalorder %s21_s19, %s21_s19 }
   0xb   :  { %p717_p3 = scmp.ne.s32.totalorder %s21_s19, %s716_s27  ;;  %p722_p5 = scmp.lt.s32.totalorder %s716_s27, %s716_s27 }
   0xd   :  { %p723_p6 = por %p722_p5, %p721_p4 }
   0xf   :  { %p724_p7 = pnand %p723_p6, %p717_p3 }
  0x11   :  { %727 = shalt.err (!%p724_p7)
}
  0x12   :  { %s803_s28 = smov 128   ;;  %s804_s29 = smov 8  }
  0x13   :  { %26 = dma.hbm_to_vmem [thread:$0]  %s1093_s0, 512, %s21_s19, [#allocation3], %s803_s28, %s803_s28, %s804_s29  }
  0x14   :  { %s805_s7 = smov [#allocation5]   ;;  %s728_s11 = scalar_lea.hbm %s1094_s1, 4096 }
  0x15   :  { %s32_s8 = sshll.u32 %s805_s7, 4  ;;  %p729_p8 = scmp.ne.s32.totalorder %s1094_s1, %s728_s11  ;;  %s33_s8 = int_to_ptr.vmem [resolvable:$true] %s32_s8 }
  0x16   :  { %p732_p9 = scmp.lt.u32.totalorder %s728_s11, %s1094_s1 }
  0x18   :  { %p734_p10 = pnand %p732_p9, %p729_p8 }
  0x1a   :  { %737 = shalt.err (!%p734_p10)
}
  0x1b   :  { %s738_s16 = scalar_lea.vmem %s33_s8, 4096  ;;  %p743_p12 = scmp.lt.s32.totalorder %s33_s8, %s33_s8 }
  0x1c   :  { %p739_p11 = scmp.ne.s32.totalorder %s33_s8, %s738_s16  ;;  %p744_p13 = scmp.lt.s32.totalorder %s738_s16, %s738_s16 }
  0x1e   :  { %p745_p0 = por %p744_p13, %p743_p12 }
  0x20   :  { %p746_p1 = pnand %p745_p0, %p739_p11 }
  0x22   :  { %749 = shalt.err (!%p746_p1)
}
  0x23   :  { %s806_s0 = smov 1024   ;;  %s807_s17 = smov 64  }
  0x24   :  { %38 = dma.hbm_to_vmem [thread:$0]  %s1094_s1, 4096, %s33_s8, [#allocation6], %s806_s0, %s806_s0, %s807_s17  }
  0x25   :  { %794 = dma.done.wait [#allocation3], 512  }
  0x26   :  { %795 = vsyncadd [#allocation3], 4294966784 }
  0x27   :  { %796 = dma.done.wait [#allocation6], 4096  }
  0x28   :  { %797 = vsyncadd [#allocation6], 4294963200  ;;  %v529_v0 = vlaneseq  ;;  %v867_v1 = vld [vmem:[#allocation2 + $0x18] sm:$0xff]  ;;  %v50_v2 = vld [vmem:[#allocation2 + $0x8] sm:$0xff]  ;;  %vm540_vm0 = vcmask 253952   ;;  %vm535_vm1 = vcmask 261120  }
  0x29   :  { %383 = vadd.xlane.f32.xlu0 %v867_v1  ;;  %379 = vadd.xlane.f32.xlu1 %v50_v2  ;;  %v51_v3 = vld [vmem:[#allocation2 + $0x10] sm:$0xff]  ;;  %v49_v4 = vld [vmem:[#allocation2] sm:$0xff]  ;;  %v54_v6 = vld [vmem:[#allocation5 + $0x8] sm:$0xff]  ;;  %v386_v17 = vmul.f32 %v50_v2, %v50_v2  ;;  %v388_v32 = vmul.f32 %v867_v1, %v867_v1  ;;  %vm501_vm2 = vcmask 1047559  }
  0x2a   :  { %v53_v5 = vld [vmem:[#allocation5] sm:$0xff]  ;;  %v55_v7 = vld [vmem:[#allocation5 + $0x10] sm:$0xff]  ;;  %v871_v8 = vshrl.u32 %v529_v0, 7  ;;  %v56_v9 = vld [vmem:[#allocation5 + $0x18] sm:$0xff]  ;;  %v88_v13 = vmul.f32 0.5, %v54_v6  ;;  %v385_v18 = vmul.f32 %v49_v4, %v49_v4  ;;  %v387_v33 = vmul.f32 %v51_v3, %v51_v3 }
  0x2b   :  { %v57_v10 = vld [vmem:[#allocation5 + $0x20] sm:$0xff]  ;;  %v58_v11 = vld [vmem:[#allocation5 + $0x28] sm:$0xff]  ;;  %v87_v12 = vmul.f32 0.5, %v53_v5  ;;  %v89_v14 = vmul.f32 0.5, %v55_v7  ;;  %v59_v15 = vld [vmem:[#allocation5 + $0x30] sm:$0xff]  ;;  %v90_v16 = vmul.f32 0.5, %v56_v9 }
  0x2c   :  { %v85_v19 = vld [vmem:[%s1095_s2] sm:$0x1]  ;;  %v60_v21 = vld [vmem:[#allocation5 + $0x38] sm:$0xff]  ;;  %v91_v22 = vmul.f32 0.5, %v57_v10  ;;  %v92_v23 = vmul.f32 0.5, %v58_v11  ;;  %v93_v25 = vmul.f32 0.5, %v59_v15 }
  0x2d   :  { %381 = vadd.xlane.f32.xlu1 %v51_v3  ;;  %377 = vadd.xlane.f32.xlu0 %v49_v4  ;;  %v879_v20 = vld [vmem:[%s1096_s3] sm:$0xff]  ;;  %624 = vtanh.f32 %v87_v12  ;;  %v70_v26 = vld [vmem:[#allocation5 + $0x88] sm:$0xff]  ;;  %v531_v27 = vsub.s32 0, %v871_v8  ;;  %v539_v28 = vmul.f32 %v85_v19, %v85_v19  ;;  %v94_v30 = vmul.f32 0.5, %v60_v21  ;;  %v71_v31 = vld [vmem:[#allocation5 + $0x90] sm:$0xff]  ;;  %s808_s2 = smov [#allocation7]  }
  0x2e   :  { %626 = vtanh.f32 %v88_v13  ;;  %v69_v24 = vld [vmem:[#allocation5 + $0x80] sm:$0xff]  ;;  %v544_v29 = vmul.f32 %v879_v20, %v879_v20  ;;  %v72_v34 = vld [vmem:[#allocation5 + $0x98] sm:$0xff]  ;;  %v74_v37 = vld [vmem:[#allocation5 + $0xa8] sm:$0xff]  ;;  %v104_v39 = vmul.f32 0.5, %v70_v26  ;;  %v105_v41 = vmul.f32 0.5, %v71_v31  ;;  %s588_s3 = sshll.u32 %s808_s2, 4  ;;  %s589_s3 = int_to_ptr.vmem [resolvable:$true] %s588_s3 }
  0x2f   :  { %628 = vtanh.f32 %v89_v14  ;;  %v103_v35 = vmul.f32 0.5, %v69_v24  ;;  %v73_v36 = vld [vmem:[#allocation5 + $0xa0] sm:$0xff]  ;;  %v75_v38 = vld [vmem:[#allocation5 + $0xb0] sm:$0xff]  ;;  %v76_v40 = vld [vmem:[#allocation5 + $0xb8] sm:$0xff]  ;;  %v888_v44 = vrot.slane %v85_v19, %v531_v27  ;;  %v541_v45 = vsel %vm540_vm0, %v539_v28, 0.0  ;;  %s750_s23 = scalar_lea.vmem %s589_s3, 4096  ;;  %p755_p3 = scmp.lt.s32.totalorder %s589_s3, %s589_s3 }
  0x30   :  { %630 = vtanh.f32 %v90_v16  ;;  %v61_v42 = vld [vmem:[#allocation5 + $0x40] sm:$0xff]  ;;  %v62_v43 = vld [vmem:[#allocation5 + $0x48] sm:$0xff]  ;;  %v545_v46 = vsel %vm535_vm1, %v544_v29, 0.0  ;;  %v106_v47 = vmul.f32 0.5, %v72_v34  ;;  %v63_v48 = vld [vmem:[#allocation5 + $0x50] sm:$0xff]  ;;  %v107_v51 = vmul.f32 0.5, %v73_v36  ;;  %p751_p2 = scmp.ne.s32.totalorder %s589_s3, %s750_s23  ;;  %p756_p4 = scmp.lt.s32.totalorder %s750_s23, %s750_s23 }
  0x31   :  { %391 = vadd.xlane.f32.xlu1 %v386_v17  ;;  %389 = vadd.xlane.f32.xlu0 %v385_v18  ;;  %632 = vtanh.f32 %v91_v22  ;;  %v64_v49 = vld [vmem:[#allocation5 + $0x58] sm:$0xff]  ;;  %v65_v50 = vld [vmem:[#allocation5 + $0x60] sm:$0xff]  ;;  %v108_v52 = vmul.f32 0.5, %v74_v37  ;;  %v109_v53 = vmul.f32 0.5, %v75_v38  ;;  %v66_v54 = vld [vmem:[#allocation5 + $0x68] sm:$0xff]  ;;  %v110_v56 = vmul.f32 0.5, %v76_v40 }
  0x32   :  { %634 = vtanh.f32 %v92_v23  ;;  %v67_v55 = vld [vmem:[#allocation5 + $0x70] sm:$0xff]  ;;  %v68_v57 = vld [vmem:[#allocation5 + $0x78] sm:$0xff]  ;;  %v95_v58 = vmul.f32 0.5, %v61_v42  ;;  %v96_v59 = vmul.f32 0.5, %v62_v43  ;;  %v77_v60 = vld [vmem:[#allocation5 + $0xc0] sm:$0xff]  ;;  %v97_v62 = vmul.f32 0.5, %v63_v48  ;;  %p757_p5 = por %p756_p4, %p755_p3 }
  0x33   :  { %636 = vtanh.f32 %v93_v25  ;;  %v98_v63 = vmul.f32 0.5, %v64_v49  ;;  %v892_v2 = vmul.f32 0.5, %v65_v50  ;;  %v78_v3 = vld [vmem:[#allocation5 + $0xc8] sm:$0xff]  ;;  %v894_v6 = vmul.f32 0.5, %v66_v54  ;;  %v79_v9 = vld [vmem:[#allocation5 + $0xd0] sm:$0xff]  ;;  %v80_v13 = vld [vmem:[#allocation5 + $0xd8] sm:$0xff] }
  0x34   :  { %638 = vtanh.f32 %v94_v30  ;;  %v896_v7 = vmul.f32 0.5, %v67_v55  ;;  %v898_v12 = vmul.f32 0.5, %v68_v57  ;;  %v900_v14 = vmul.f32 0.5, %v77_v60  ;;  %v81_v23 = vld [vmem:[#allocation5 + $0xe0] sm:$0xff]  ;;  %v82_v34 = vld [vmem:[#allocation5 + $0xe8] sm:$0xff]  ;;  %v83_v43 = vld [vmem:[#allocation5 + $0xf0] sm:$0xff]  ;;  %p758_p6 = pnand %p757_p5, %p751_p2 }
  0x35   :  { %395 = vadd.xlane.f32.xlu1 %v388_v32  ;;  %393 = vadd.xlane.f32.xlu0 %v387_v33  ;;  %640 = vtanh.f32 %v103_v35  ;;  %v904_v18 = vmul.f32 0.5, %v78_v3  ;;  %v908_v24 = vmul.f32 0.5, %v79_v9  ;;  %v913_v29 = vmul.f32 0.5, %v80_v13 }
  0x36   :  { %642 = vtanh.f32 %v104_v39  ;;  %v923_v38 = vmul.f32 0.5, %v81_v23  ;;  %v932_v48 = vmul.f32 0.5, %v82_v34  ;;  %v943_v57 = vmul.f32 0.5, %v83_v43 }
  0x37   :  { %v625_v61 = vpop.eup %624  ;;  %644 = vtanh.f32 %v105_v41 }
  0x38   :  { %v627_v4 = vpop.eup %626  ;;  %v151_v5 = vmul.f32 0.5, %v625_v61  ;;  %646 = vtanh.f32 %v106_v47 }
  0x39   :  { %v629_v10 = vpop.eup %628  ;;  %542 = vadd.xlane.f32.xlu0 %v541_v45  ;;  %546 = vadd.xlane.f32.xlu1 %v545_v46  ;;  %v152_v11 = vmul.f32 0.5, %v627_v4  ;;  %648 = vtanh.f32 %v107_v51 }
  0x3a   :  { %v631_v15 = vpop.eup %630  ;;  %v153_v16 = vmul.f32 0.5, %v629_v10  ;;  %v902_v17 = vadd.f32 0.5, %v151_v5  ;;  %650 = vtanh.f32 %v108_v52 }
  0x3b   :  { %v633_v19 = vpop.eup %632  ;;  %v154_v21 = vmul.f32 0.5, %v631_v15  ;;  %v906_v22 = vadd.f32 0.5, %v152_v11  ;;  %652 = vtanh.f32 %v109_v53  ;;  %v84_v53 = vld [vmem:[#allocation5 + $0xf8] sm:$0xff] }
  0x3c   :  { %v635_v25 = vpop.eup %634  ;;  %v155_v26 = vmul.f32 0.5, %v633_v19  ;;  %v910_v28 = vadd.f32 0.5, %v153_v16  ;;  %215 = vst [vmem:[#allocation7] sm:$0xff] %v902_v17  ;;  %654 = vtanh.f32 %v110_v56  ;;  %v954_v3 = vmul.f32 0.5, %v84_v53 }
  0x3d   :  { %v637_v30 = vpop.eup %636  ;;  %v156_v31 = vmul.f32 0.5, %v635_v25  ;;  %v915_v32 = vadd.f32 0.5, %v154_v21  ;;  %216 = vst [vmem:[#allocation7 + $0x8] sm:$0xff] %v906_v22  ;;  %v247_v33 = vmax.f32 %v902_v17, %v906_v22  ;;  %656 = vtanh.f32 %v95_v58 }
  0x3e   :  { %v639_v35 = vpop.eup %638  ;;  %v157_v36 = vmul.f32 0.5, %v637_v30  ;;  %v920_v37 = vadd.f32 0.5, %v155_v26  ;;  %217 = vst [vmem:[#allocation7 + $0x10] sm:$0xff] %v910_v28  ;;  %658 = vtanh.f32 %v96_v59 }
  0x3f   :  { %v641_v39 = vpop.eup %640  ;;  %v158_v40 = vmul.f32 0.5, %v639_v35  ;;  %v925_v41 = vadd.f32 0.5, %v156_v31  ;;  %218 = vst [vmem:[#allocation7 + $0x18] sm:$0xff] %v915_v32  ;;  %v248_v42 = vmax.f32 %v247_v33, %v910_v28  ;;  %660 = vtanh.f32 %v97_v62 }
  0x40   :  { %v643_v45 = vpop.eup %642  ;;  %v929_v46 = vadd.f32 0.5, %v157_v36  ;;  %219 = vst [vmem:[#allocation7 + $0x20] sm:$0xff] %v920_v37  ;;  %v167_v47 = vmul.f32 0.5, %v641_v39  ;;  %662 = vtanh.f32 %v98_v63 }
  0x41   :  { %v645_v49 = vpop.eup %644  ;;  %v934_v50 = vadd.f32 0.5, %v158_v40  ;;  %220 = vst [vmem:[#allocation7 + $0x28] sm:$0xff] %v925_v41  ;;  %v249_v51 = vmax.f32 %v248_v42, %v915_v32  ;;  %v168_v52 = vmul.f32 0.5, %v643_v45  ;;  %664 = vtanh.f32 %v892_v2 }
  0x42   :  { %v647_v54 = vpop.eup %646  ;;  %221 = vst [vmem:[#allocation7 + $0x30] sm:$0xff] %v929_v46  ;;  %v169_v55 = vmul.f32 0.5, %v645_v49  ;;  %v940_v56 = vadd.f32 0.5, %v167_v47  ;;  %666 = vtanh.f32 %v894_v6 }
  0x43   :  { %v649_v58 = vpop.eup %648  ;;  %222 = vst [vmem:[#allocation7 + $0x38] sm:$0xff] %v934_v50  ;;  %v250_v59 = vmax.f32 %v249_v51, %v920_v37  ;;  %v170_v60 = vmul.f32 0.5, %v647_v54  ;;  %v947_v61 = vadd.f32 0.5, %v168_v52  ;;  %668 = vtanh.f32 %v896_v7 }
  0x44   :  { %v651_v62 = vpop.eup %650  ;;  %v171_v63 = vmul.f32 0.5, %v649_v58  ;;  %v950_v2 = vadd.f32 0.5, %v169_v55  ;;  %231 = vst [vmem:[#allocation7 + $0x80] sm:$0xff] %v940_v56  ;;  %670 = vtanh.f32 %v898_v12  ;;  %v968_v12 = vmul.f32 %v902_v17, %v902_v17 }
  0x45   :  { %v653_v4 = vpop.eup %652  ;;  %v251_v5 = vmax.f32 %v250_v59, %v925_v41  ;;  %v172_v6 = vmul.f32 0.5, %v651_v62  ;;  %v957_v9 = vadd.f32 0.5, %v170_v60  ;;  %232 = vst [vmem:[#allocation7 + $0x88] sm:$0xff] %v947_v61  ;;  %v265_v7 = vmax.f32 %v940_v56, %v947_v61 }
  0x46   :  { %v655_v10 = vpop.eup %654  ;;  %v173_v11 = vmul.f32 0.5, %v653_v4  ;;  %v962_v13 = vadd.f32 0.5, %v171_v63  ;;  %233 = vst [vmem:[#allocation7 + $0x90] sm:$0xff] %v950_v2  ;;  %672 = vtanh.f32 %v900_v14  ;;  %v981_v17 = vmul.f32 %v906_v22, %v906_v22 }
  0x47   :  { %v657_v15 = vpop.eup %656  ;;  %v252_v16 = vmax.f32 %v251_v5, %v929_v46  ;;  %v174_v19 = vmul.f32 0.5, %v655_v10  ;;  %v971_v21 = vadd.f32 0.5, %v172_v6  ;;  %234 = vst [vmem:[#allocation7 + $0x98] sm:$0xff] %v957_v9  ;;  %v266_v23 = vmax.f32 %v265_v7, %v950_v2 }
  0x48   :  { %v659_v25 = vpop.eup %658  ;;  %v975_v26 = vadd.f32 0.5, %v173_v11  ;;  %235 = vst [vmem:[#allocation7 + $0xa0] sm:$0xff] %v962_v13  ;;  %v159_v14 = vmul.f32 0.5, %v657_v15  ;;  %674 = vtanh.f32 %v904_v18  ;;  %v992_v18 = vmul.f32 %v910_v28, %v910_v28 }
  0x49   :  { %v661_v30 = vpop.eup %660  ;;  %v253_v31 = vmax.f32 %v252_v16, %v934_v50  ;;  %v984_v33 = vadd.f32 0.5, %v174_v19  ;;  %236 = vst [vmem:[#allocation7 + $0xa8] sm:$0xff] %v971_v21  ;;  %v267_v34 = vmax.f32 %v266_v23, %v957_v9  ;;  %v160_v35 = vmul.f32 0.5, %v659_v25 }
  0x4a   :  { %v663_v36 = vpop.eup %662  ;;  %237 = vst [vmem:[#allocation7 + $0xb0] sm:$0xff] %v975_v26  ;;  %v161_v39 = vmul.f32 0.5, %v661_v30  ;;  %v191_v40 = vadd.f32 0.5, %v159_v14  ;;  %676 = vtanh.f32 %v908_v24  ;;  %v1002_v15 = vmul.f32 %v915_v32, %v915_v32 }
  0x4b   :  { %v665_v22 = vpop.eup %664  ;;  %254 = vmax.xlane.f32.xlu0 %v253_v31  ;;  %238 = vst [vmem:[#allocation7 + $0xb8] sm:$0xff] %v984_v33  ;;  %v268_v42 = vmax.f32 %v267_v34, %v962_v13  ;;  %v162_v43 = vmul.f32 0.5, %v663_v36  ;;  %v192_v45 = vadd.f32 0.5, %v160_v35  ;;  %678 = vtanh.f32 %v913_v29 }
  0x4c   :  { %v667_v47 = vpop.eup %666  ;;  %v163_v49 = vmul.f32 0.5, %v665_v22  ;;  %v193_v51 = vadd.f32 0.5, %v161_v39  ;;  %223 = vst [vmem:[#allocation7 + $0x40] sm:$0xff] %v191_v40  ;;  %v291_v52 = vmul.f32 %v191_v40, %v191_v40  ;;  %680 = vtanh.f32 %v923_v38 }
  0x4d   :  { %v669_v24 = vpop.eup %668  ;;  %v269_v28 = vmax.f32 %v268_v42, %v971_v21  ;;  %v164_v53 = vmul.f32 0.5, %v667_v47  ;;  %v194_v54 = vadd.f32 0.5, %v162_v43  ;;  %224 = vst [vmem:[#allocation7 + $0x48] sm:$0xff] %v192_v45  ;;  %v256_v55 = vmax.f32 %v191_v40, %v192_v45 }
  0x4e   :  { %v671_v58 = vpop.eup %670  ;;  %v165_v59 = vmul.f32 0.5, %v669_v24  ;;  %v195_v60 = vadd.f32 0.5, %v163_v49  ;;  %225 = vst [vmem:[#allocation7 + $0x50] sm:$0xff] %v193_v51  ;;  %v292_v62 = vmul.f32 %v192_v45, %v192_v45  ;;  %v293_v29 = vmul.f32 %v193_v51, %v193_v51 }
  0x4f   :  { %v270_v63 = vmax.f32 %v269_v28, %v975_v26  ;;  %v166_v4 = vmul.f32 0.5, %v671_v58  ;;  %v196_v5 = vadd.f32 0.5, %v164_v53  ;;  %226 = vst [vmem:[#allocation7 + $0x58] sm:$0xff] %v194_v54  ;;  %v257_v6 = vmax.f32 %v256_v55, %v193_v51 }
  0x50   :  { %v673_v38 = vpop.eup %672  ;;  %v197_v7 = vadd.f32 0.5, %v165_v59  ;;  %227 = vst [vmem:[#allocation7 + $0x60] sm:$0xff] %v195_v60  ;;  %v294_v10 = vmul.f32 %v194_v54, %v194_v54  ;;  %v324_v11 = vadd.f32 %v292_v62, %v291_v52  ;;  %v299_v25 = vmul.f32 %v940_v56, %v940_v56 }
  0x51   :  { %v271_v16 = vmax.f32 %v270_v63, %v984_v33  ;;  %v198_v19 = vadd.f32 0.5, %v166_v4  ;;  %228 = vst [vmem:[#allocation7 + $0x68] sm:$0xff] %v196_v5  ;;  %v258_v23 = vmax.f32 %v257_v6, %v194_v54  ;;  %v295_v30 = vmul.f32 %v195_v60, %v195_v60 }
  0x52   :  { %v675_v14 = vpop.eup %674  ;;  %229 = vst [vmem:[#allocation7 + $0x70] sm:$0xff] %v197_v7  ;;  %v325_v31 = vadd.f32 %v324_v11, %v293_v29  ;;  %682 = vtanh.f32 %v932_v48  ;;  %v175_v34 = vmul.f32 0.5, %v673_v38  ;;  %v300_v36 = vmul.f32 %v947_v61, %v947_v61 }
  0x53   :  { %272 = vmax.xlane.f32.xlu0 %v271_v16  ;;  %230 = vst [vmem:[#allocation7 + $0x78] sm:$0xff] %v198_v19  ;;  %v259_v35 = vmax.f32 %v258_v23, %v195_v60  ;;  %684 = vtanh.f32 %v943_v57  ;;  %v176_v32 = vmul.f32 0.5, %v675_v14  ;;  %v296_v40 = vmul.f32 %v196_v5, %v196_v5 }
  0x54   :  { %v677_v39 = vpop.eup %676  ;;  %v326_v22 = vadd.f32 %v325_v31, %v294_v10  ;;  %686 = vtanh.f32 %v954_v3  ;;  %v207_v56 = vadd.f32 0.5, %v175_v34  ;;  %v301_v47 = vmul.f32 %v950_v2, %v950_v2 }
  0x55   :  { %v679_v42 = vpop.eup %678  ;;  %v260_v43 = vmax.f32 %v259_v35, %v196_v5  ;;  %v177_v45 = vmul.f32 0.5, %v677_v39  ;;  %v208_v48 = vadd.f32 0.5, %v176_v32  ;;  %v297_v51 = vmul.f32 %v197_v7, %v197_v7 }
  0x56   :  { %v681_v49 = vpop.eup %680  ;;  %v327_v57 = vadd.f32 %v326_v22, %v295_v30  ;;  %v178_v52 = vmul.f32 0.5, %v679_v42  ;;  %239 = vst [vmem:[#allocation7 + $0xc0] sm:$0xff] %v207_v56  ;;  %v302_v61 = vmul.f32 %v957_v9, %v957_v9  ;;  %v298_v54 = vmul.f32 %v198_v19, %v198_v19 }
  0x57   :  { %v261_v24 = vmax.f32 %v260_v43, %v197_v7  ;;  %v179_v28 = vmul.f32 0.5, %v681_v49  ;;  %v209_v53 = vadd.f32 0.5, %v177_v45  ;;  %240 = vst [vmem:[#allocation7 + $0xc8] sm:$0xff] %v208_v48  ;;  %v274_v3 = vmax.f32 %v207_v56, %v208_v48 }
  0x58   :  { %v328_v55 = vadd.f32 %v327_v57, %v296_v40  ;;  %v210_v58 = vadd.f32 0.5, %v178_v52  ;;  %v333_v59 = vadd.f32 %v300_v36, %v299_v25  ;;  %v303_v29 = vmul.f32 %v962_v13, %v962_v13 }
  0x59   :  { %v262_v60 = vmax.f32 %v261_v24, %v198_v19  ;;  %v211_v62 = vadd.f32 0.5, %v179_v28  ;;  %241 = vst [vmem:[#allocation7 + $0xd0] sm:$0xff] %v209_v53  ;;  %v275_v2 = vmax.f32 %v274_v3, %v209_v53  ;;  %v304_v9 = vmul.f32 %v971_v21, %v971_v21 }
  0x5a   :  { %v329_v63 = vadd.f32 %v328_v55, %v297_v51  ;;  %242 = vst [vmem:[#allocation7 + $0xd8] sm:$0xff] %v210_v58  ;;  %v305_v4 = vmul.f32 %v975_v26, %v975_v26  ;;  %v334_v5 = vadd.f32 %v333_v59, %v301_v47  ;;  %v315_v38 = vadd.f32 %v981_v17, %v968_v12 }
  0x5b   :  { %263 = vmax.xlane.f32.xlu1 %v262_v60  ;;  %243 = vst [vmem:[#allocation7 + $0xe0] sm:$0xff] %v211_v62  ;;  %v276_v6 = vmax.f32 %v275_v2, %v210_v58  ;;  %v307_v7 = vmul.f32 %v207_v56, %v207_v56  ;;  %v308_v10 = vmul.f32 %v208_v48, %v208_v48 }
  0x5c   :  { %v683_v11 = vpop.eup %682  ;;  %v330_v16 = vadd.f32 %v329_v63, %v298_v54  ;;  %v306_v13 = vmul.f32 %v984_v33, %v984_v33  ;;  %v335_v19 = vadd.f32 %v334_v5, %v302_v61  ;;  %v309_v23 = vmul.f32 %v209_v53, %v209_v53 }
  0x5d   :  { %v685_v21 = vpop.eup %684  ;;  %v180_v25 = vmul.f32 0.5, %v683_v11  ;;  %v277_v14 = vmax.f32 %v276_v6, %v211_v62  ;;  %v287_v26 = vmul.f32 %v920_v37, %v920_v37  ;;  %v316_v30 = vadd.f32 %v315_v38, %v992_v18 }
  0x5e   :  { %v687_v31 = vpop.eup %686  ;;  %331 = vadd.xlane.f32.xlu0 %v330_v16  ;;  %v181_v12 = vmul.f32 0.5, %v685_v21  ;;  %v336_v17 = vadd.f32 %v335_v19, %v303_v29  ;;  %v310_v34 = vmul.f32 %v210_v58, %v210_v58  ;;  %v342_v35 = vadd.f32 %v308_v10, %v307_v7 }
  0x5f   :  { %v182_v32 = vmul.f32 0.5, %v687_v31  ;;  %v212_v36 = vadd.f32 0.5, %v180_v25  ;;  %v288_v33 = vmul.f32 %v925_v41, %v925_v41  ;;  %v317_v39 = vadd.f32 %v316_v30, %v1002_v15 }
  0x60   :  { %v213_v40 = vadd.f32 0.5, %v181_v12  ;;  %v337_v22 = vadd.f32 %v336_v17, %v304_v9  ;;  %v311_v56 = vmul.f32 %v211_v62, %v211_v62  ;;  %v343_v42 = vadd.f32 %v342_v35, %v309_v23 }
  0x61   :  { %v214_v37 = vadd.f32 0.5, %v182_v32  ;;  %244 = vst [vmem:[#allocation7 + $0xe8] sm:$0xff] %v212_v36  ;;  %v278_v18 = vmax.f32 %v277_v14, %v212_v36  ;;  %v289_v43 = vmul.f32 %v929_v46, %v929_v46  ;;  %v318_v45 = vadd.f32 %v317_v39, %v287_v26 }
  0x62   :  { %245 = vst [vmem:[#allocation7 + $0xf0] sm:$0xff] %v213_v40  ;;  %v338_v48 = vadd.f32 %v337_v22, %v305_v4  ;;  %v312_v47 = vmul.f32 %v212_v36, %v212_v36  ;;  %v344_v49 = vadd.f32 %v343_v42, %v310_v34  ;;  %v290_v41 = vmul.f32 %v934_v50, %v934_v50 }
  0x63   :  { %246 = vst [vmem:[#allocation7 + $0xf8] sm:$0xff] %v214_v37  ;;  %v279_v51 = vmax.f32 %v278_v18, %v213_v40  ;;  %v319_v15 = vadd.f32 %v318_v45, %v288_v33  ;;  %v534_v57 = vmul.f32 %v888_v44, %v879_v20  ;;  %v313_v61 = vmul.f32 %v213_v40, %v213_v40 }
  0x64   :  { %v339_v52 = vadd.f32 %v338_v48, %v306_v13  ;;  %v345_v24 = vadd.f32 %v344_v49, %v311_v56  ;;  %v314_v55 = vmul.f32 %v214_v37, %v214_v37 }
  0x65   :  { %v280_v28 = vmax.f32 %v279_v51, %v214_v37  ;;  %v320_v53 = vadd.f32 %v319_v15, %v289_v43  ;;  %v536_v54 = vsel %vm535_vm1, %v534_v57, 0.0 }
  0x66   :  { %340 = vadd.xlane.f32.xlu0 %v339_v52  ;;  %v346_v46 = vadd.f32 %v345_v24, %v312_v47 }
  0x67   :  { %281 = vmax.xlane.f32.xlu1 %v280_v28  ;;  %v321_v3 = vadd.f32 %v320_v53, %v290_v41 }
  0x68   :  { %v347_v58 = vadd.f32 %v346_v46, %v313_v61 }
  0x6a   :  { %537 = vadd.xlane.f32.xlu0 %v536_v54  ;;  %v348_v50 = vadd.f32 %v347_v58, %v314_v55 }
  0x6b   :  { %322 = vadd.xlane.f32.xlu1 %v321_v3 }
  0x6f   :  { %349 = vadd.xlane.f32.xlu1 %v348_v50 }
  0xb6   :  { %v384_v59 = vpop.xlane.xlu0 %383  ;;  %v380_v60 = vpop.xlane.xlu1 %379 }
  0xb7   :  { %v401_v20 = vmul.f32 0.0078125, %v384_v59  ;;  %v399_v44 = vmul.f32 0.0078125, %v380_v60 }
  0xb9   :  { %v405_v62 = vmul.f32 %v401_v20, %v384_v59  ;;  %v498_v2 = vsub.f32 %v867_v1, %v401_v20  ;;  %v403_v9 = vmul.f32 %v399_v44, %v380_v60 }
  0xba   :  { %v382_v29 = vpop.xlane.xlu1 %381  ;;  %v378_v63 = vpop.xlane.xlu0 %377 }
  0xbb   :  { %v398_v4 = vmul.f32 0.0078125, %v378_v63  ;;  %v499_v5 = vmul.f32 %v498_v2, %v498_v2  ;;  %v400_v6 = vmul.f32 0.0078125, %v382_v29  ;;  %v466_v35 = vadd.f32 %v380_v60, %v378_v63 }
  0xbd   :  { %v402_v38 = vmul.f32 %v398_v4, %v378_v63  ;;  %v505_v7 = vmul.f32 %v499_v5, %v499_v5  ;;  %v500_v16 = vmul.f32 %v499_v5, %v498_v2  ;;  %v404_v23 = vmul.f32 %v400_v6, %v382_v29 }
  0xbe   :  { %v1040_v10 = vpop.xlane.xlu1 %391  ;;  %v1042_v11 = vpop.xlane.xlu0 %389  ;;  %v467_v33 = vadd.f32 %v466_v35, %v382_v29 }
  0xbf   :  { %v407_v13 = vsub.f32 %v1040_v10, %v403_v9  ;;  %v406_v19 = vsub.f32 %v1042_v11, %v402_v38  ;;  %v506_v1 = vsel %vm501_vm2, %v505_v7, 0.0  ;;  %v502_v21 = vsel %vm501_vm2, %v500_v16, 0.0 }
  0xc0   :  { %507 = vadd.xlane.f32.xlu1 %v506_v1  ;;  %503 = vadd.xlane.f32.xlu0 %v502_v21  ;;  %v468_v22 = vadd.f32 %v467_v33, %v384_v59 }
  0xc1   :  { %v411_v25 = vmax.f32 %v407_v13, 0.0  ;;  %v410_v14 = vmax.f32 %v406_v19, 0.0 }
  0xc2   :  { %v1046_v26 = vpop.xlane.xlu1 %395  ;;  %v1048_v30 = vpop.xlane.xlu0 %393  ;;  %v469_v45 = vrot.slane %v468_v22, 4 }
  0xc3   :  { %v416_v31 = vmul.f32 0.007874016, %v411_v25  ;;  %v415_v12 = vmul.f32 0.007874016, %v410_v14  ;;  %v409_v17 = vsub.f32 %v1046_v26, %v405_v62  ;;  %v408_v34 = vsub.f32 %v1048_v30, %v404_v23 }
  0xc4   :  { %v470_v52 = vadd.f32 %v469_v45, %v468_v22 }
  0xc5   :  { %688 = vrsqrt.f32 %v416_v31  ;;  %v1052_v32 = vmax.f32 %v409_v17, 0.0  ;;  %v412_v36 = vmax.f32 %v408_v34, 0.0  ;;  %vm428_vm3 = vcmp.eq.f32.partialorder %v416_v31, inf }
  0xc6   :  { %690 = vrsqrt.f32 %v415_v12  ;;  %v431_v42 = vand.u32 2147483648, %v416_v31  ;;  %vm430_vm4 = vcmp.eq.f32.partialorder %v416_v31, 0.0  ;;  %vm421_vm5 = vcmp.eq.f32.partialorder %v415_v12, inf }
  0xc7   :  { %v418_v39 = vmul.f32 0.007874016, %v1052_v32  ;;  %v417_v40 = vmul.f32 0.007874016, %v412_v36  ;;  %v424_v43 = vand.u32 2147483648, %v415_v12  ;;  %vm423_vm6 = vcmp.eq.f32.partialorder %v415_v12, 0.0 }
  0xc8   :  { %v471_v20 = vrot.slane %v470_v52, 2 }
  0xc9   :  { %692 = vrsqrt.f32 %v418_v39  ;;  %vm442_vm7 = vcmp.eq.f32.partialorder %v418_v39, inf  ;;  %v445_v53 = vand.u32 2147483648, %v418_v39  ;;  %vm435_vm8 = vcmp.eq.f32.partialorder %v417_v40, inf }
  0xca   :  { %694 = vrsqrt.f32 %v417_v40  ;;  %v438_v46 = vand.u32 2147483648, %v417_v40  ;;  %vm437_vm9 = vcmp.eq.f32.partialorder %v417_v40, 0.0  ;;  %vm444_vm10 = vcmp.eq.f32.partialorder %v418_v39, 0.0 }
  0xcf   :  { %v689_v56 = vpop.eup %688 }
  0xd0   :  { %v691_v37 = vpop.eup %690  ;;  %v427_v18 = vmul.f32 %v689_v56, %v416_v31 }
  0xd1   :  { %v420_v48 = vmul.f32 %v691_v37, %v415_v12 }
  0xd2   :  { %v429_v47 = vsel %vm428_vm3, %v416_v31, %v427_v18 }
  0xd3   :  { %v432_v49 = vsel %vm430_vm4, %v431_v42, %v429_v47  ;;  %v422_v51 = vsel %vm421_vm5, %v415_v12, %v420_v48  ;;  %v693_v57 = vpop.eup %692 }
  0xd4   :  { %v448_v41 = vsub.f32 1.0, %v432_v49  ;;  %v425_v15 = vsel %vm423_vm6, %v424_v43, %v422_v51  ;;  %v695_v24 = vpop.eup %694  ;;  %v441_v28 = vmul.f32 %v693_v57, %v418_v39 }
  0xd5   :  { %v447_v61 = vsub.f32 1.0, %v425_v15  ;;  %v434_v3 = vmul.f32 %v695_v24, %v417_v40 }
  0xd6   :  { %v452_v54 = vand.u32 2147483647, %v448_v41  ;;  %v443_v58 = vsel %vm442_vm7, %v418_v39, %v441_v28 }
  0xd7   :  { %v451_v55 = vand.u32 2147483647, %v447_v61  ;;  %v436_v50 = vsel %vm435_vm8, %v417_v40, %v434_v3  ;;  %v446_v59 = vsel %vm444_vm10, %v445_v53, %v443_v58 }
  0xd8   :  { %v439_v60 = vsel %vm437_vm9, %v438_v46, %v436_v50  ;;  %v450_v44 = vsub.f32 1.0, %v446_v59 }
  0xd9   :  { %v449_v62 = vsub.f32 1.0, %v439_v60  ;;  %v455_v2 = vadd.f32 %v452_v54, %v451_v55 }
  0xdb   :  { %v453_v29 = vand.u32 2147483647, %v449_v62 }
  0xdc   :  { %761 = shalt.err (!%p758_p6)
}
  0xdd   :  { %s762_s26 = scalar_lea.hbm %s1097_s4, 4096 }
  0xde   :  { %p763_p7 = scmp.ne.s32.totalorder %s1097_s4, %s762_s26  ;;  %p766_p8 = scmp.lt.u32.totalorder %s762_s26, %s1097_s4 }
  0xe0   :  { %p768_p9 = pnand %p766_p8, %p763_p7 }
  0xe2   :  { %771 = shalt.err (!%p768_p9)
}
  0xe3   :  { %594 = dma.vmem_to_hbm [thread:$0]  %s589_s3, 4096, %s1097_s4, [#allocation4], %s806_s0, %s806_s0, %s807_s17   ;;  %v472_v63 = vadd.f32 %v471_v20, %v470_v52  ;;  %v454_v9 = vand.u32 2147483647, %v450_v44  ;;  %v456_v4 = vadd.f32 %v455_v2, %v453_v29  ;;  %v543_v12 = vpop.xlane.xlu0 %542  ;;  %v547_v34 = vpop.xlane.xlu1 %546  ;;  %v490_v22 = vmul.f32 0.0078125, %v1052_v32 }
  0xe4   :  { %v551_v17 = vrot.slane %v543_v12, %v531_v27  ;;  %v478_v43 = vadd.f32 %v1040_v10, %v1042_v11  ;;  %s809_s4 = smov [#allocation8]  }
  0xe5   :  { %v457_v5 = vadd.f32 %v456_v4, %v454_v9  ;;  %v473_v6 = vrot.slane %v472_v63, 1  ;;  %vm493_vm13 = vcmp.eq.f32.partialorder %v490_v22, inf  ;;  %v496_v20 = vand.u32 2147483648, %v490_v22  ;;  %s601_s8 = sshll.u32 %s809_s4, 4  ;;  %s602_s8 = int_to_ptr.vmem [resolvable:$true] %s601_s8 }
  0xe6   :  { %v552_v35 = vmul.f32 %v551_v17, %v547_v34  ;;  %v479_v51 = vadd.f32 %v478_v43, %v1048_v30  ;;  %vm495_vm14 = vcmp.eq.f32.partialorder %v490_v22, 0.0  ;;  %s772_s9 = scalar_lea.vmem %s602_s8, 16  ;;  %s776_s10 = scalar_lea.vmem %s602_s8, 32 }
  0xe7   :  { %v458_v38 = vrot.slane %v457_v5, 4  ;;  %v474_v13 = vadd.f32 %v473_v6, %v472_v63  ;;  %v255_v33 = vpop.xlane.xlu0 %254  ;;  %v515_v63 = vmul.f32 %v490_v22, %v490_v22  ;;  %p773_p10 = scmp.ne.s32.totalorder %s602_s8, %s772_s9  ;;  %p777_p11 = scmp.lt.s32.totalorder %s602_s8, %s602_s8 }
  0xe8   :  { %696 = vrsqrt.f32 %v552_v35  ;;  %v264_v39 = vpop.xlane.xlu1 %263  ;;  %vm555_vm11 = vcmp.eq.f32.partialorder %v552_v35, inf  ;;  %v558_v56 = vand.u32 2147483648, %v552_v35  ;;  %vm557_vm12 = vcmp.eq.f32.partialorder %v552_v35, 0.0  ;;  %p778_p12 = scmp.lt.s32.totalorder %s776_s10, %s772_s9 }
  0xe9   :  { %v459_v7 = vadd.f32 %v458_v38, %v457_v5  ;;  %v476_v1 = vmul.f32 0.00024414063, %v474_v13  ;;  %698 = vrsqrt.f32 %v490_v22  ;;  %v360_v27 = vmul.f32 %v255_v33, %v255_v33 }
  0xea   :  { %v361_v45 = vmul.f32 %v264_v39, %v264_v39  ;;  %v480_v57 = vadd.f32 %v479_v51, %v1046_v26  ;;  %p779_p13 = por %p778_p12, %p777_p11 }
  0xeb   :  { %v460_v16 = vrot.slane %v459_v7, 2  ;;  %v477_v14 = vand.u32 2147483647, %v476_v1  ;;  %v273_v42 = vpop.xlane.xlu0 %272 }
  0xec   :  { %v362_v41 = vmul.f32 %v273_v42, %v273_v42  ;;  %v364_v15 = vadd.f32 %v361_v45, %v360_v27  ;;  %v481_v53 = vrot.slane %v480_v57, 4  ;;  %p780_p0 = pnand %p779_p13, %p773_p10 }
  0xed   :  { %v461_v19 = vadd.f32 %v460_v16, %v459_v7  ;;  %v516_v7 = vmax.f32 %v515_v63, 1e-08 }
  0xee   :  { %v365_v28 = vadd.f32 %v364_v15, %v362_v41  ;;  %v482_v55 = vadd.f32 %v481_v53, %v480_v57 }
  0xef   :  { %v462_v23 = vrot.slane %v461_v19, 1  ;;  %v332_v48 = vpop.xlane.xlu0 %331 }
  0xf0   :  { %v483_v26 = vrot.slane %v482_v55, 2 }
  0xf1   :  { %v463_v21 = vadd.f32 %v462_v23, %v461_v19 }
  0xf2   :  { %v697_v36 = vpop.eup %696  ;;  %v484_v4 = vadd.f32 %v483_v26, %v482_v55 }
  0xf3   :  { %v465_v25 = vmul.f32 0.03125, %v463_v21  ;;  %v554_v40 = vmul.f32 %v697_v36, %v552_v35  ;;  %v341_v52 = vpop.xlane.xlu0 %340  ;;  %v699_v61 = vpop.eup %698 }
  0xf4   :  { %v282_v37 = vpop.xlane.xlu1 %281  ;;  %v492_v46 = vmul.f32 %v699_v61, %v490_v22  ;;  %v485_v13 = vrot.slane %v484_v4, 1 }
  0xf5   :  { %v1070_v31 = vadd.f32 %v477_v14, %v465_v25  ;;  %v556_v18 = vsel %vm555_vm11, %v552_v35, %v554_v40  ;;  %v363_v24 = vmul.f32 %v282_v37, %v282_v37 }
  0xf6   :  { %v559_v8 = vsel %vm557_vm12, %v558_v56, %v556_v18  ;;  %v494_v50 = vsel %vm493_vm13, %v490_v22, %v492_v46  ;;  %v486_v21 = vadd.f32 %v485_v13, %v484_v4 }
  0xf7   :  { %v560_v49 = vmax.f32 %v559_v8, 1e-08  ;;  %v366_v3 = vadd.f32 %v365_v28, %v363_v24  ;;  %v538_v30 = vpop.xlane.xlu0 %537  ;;  %v497_v62 = vsel %vm495_vm14, %v496_v20, %v494_v50 }
  0xf8   :  { %v323_v47 = vpop.xlane.xlu1 %322  ;;  %v510_v9 = vmul.f32 %v497_v62, %v490_v22  ;;  %v487_v34 = vmul.f32 0.00024414063, %v486_v21 }
  0xf9   :  { %v351_v32 = vadd.f32 %v332_v48, %v323_v47  ;;  %700 = vrcp.f32 %v560_v49  ;;  %v367_v59 = vrot.slane %v366_v3, 4 }
  0xfa   :  { %v511_v16 = vmax.f32 %v510_v9, 1e-08  ;;  %702 = vrcp.f32 %v516_v7  ;;  %v488_v56 = vmax.f32 %v487_v34, 1.0 }
  0xfb   :  { %v352_v10 = vadd.f32 %v351_v32, %v341_v52  ;;  %v368_v2 = vadd.f32 %v367_v59, %v366_v3  ;;  %v573_v52 = vand.u32 127, %v529_v0 }
  0xfc   :  { %v350_v11 = vpop.xlane.xlu1 %349  ;;  %704 = vrcp.f32 %v511_v16  ;;  %v489_v48 = vmul.f32 4.0, %v488_v56 }
  0xfd   :  { %v353_v54 = vadd.f32 %v352_v10, %v350_v11  ;;  %v369_v6 = vrot.slane %v368_v2, 2  ;;  %vm574_vm15 = vcmp.eq.s32.totalorder %v573_v52, 0  ;;  %vm576_vm0 = vcmp.eq.s32.totalorder %v573_v52, 1 }
  0xfe   :  { %v521_v32 = vadd.f32 %v1070_v31, %v489_v48  ;;  %vm579_vm1 = vcmp.eq.s32.totalorder %v573_v52, 2 }
  0xff   :  { %v354_v60 = vrot.slane %v353_v54, 4  ;;  %v370_v23 = vadd.f32 %v369_v6, %v368_v2 }
 0x101   :  { %v355_v29 = vadd.f32 %v354_v60, %v353_v54  ;;  %v371_v14 = vrot.slane %v370_v23, 1 }
 0x103   :  { %v701_v58 = vpop.eup %700  ;;  %v356_v38 = vrot.slane %v355_v29, 2  ;;  %v372_v35 = vadd.f32 %v371_v14, %v370_v23 }
 0x104   :  { %v562_v44 = vmul.f32 %v701_v58, %v538_v30  ;;  %v703_v40 = vpop.eup %702 }
 0x105   :  { %v357_v1 = vadd.f32 %v356_v38, %v355_v29 }
 0x106   :  { %v563_v5 = vrot.slane %v562_v44, 4  ;;  %v705_v18 = vpop.eup %704 }
 0x107   :  { %v358_v12 = vrot.slane %v357_v1, 1 }
 0x108   :  { %v564_v19 = vadd.f32 %v563_v5, %v562_v44 }
 0x109   :  { %v359_v36 = vadd.f32 %v358_v12, %v357_v1 }
 0x10a   :  { %v565_v25 = vrot.slane %v564_v19, 2 }
 0x10b   :  { %v373_v43 = vsub.f32 %v359_v36, %v372_v35 }
 0x10c   :  { %v566_v17 = vadd.f32 %v565_v25, %v564_v19 }
 0x10d   :  { %v374_v49 = vmul.f32 2500.0, %v373_v43 }
 0x10e   :  { %v567_v22 = vrot.slane %v566_v17, 1 }
 0x10f   :  { %v376_v28 = vmul.f32 3.128128e-05, %v374_v49 }
 0x110   :  { %v568_v45 = vadd.f32 %v567_v22, %v566_v17 }
 0x111   :  { %v577_v46 = vsel %vm576_vm0, %v376_v28, 0.0 }
 0x112   :  { %v570_v15 = vmul.f32 0.125, %v568_v45 }
 0x114   :  { %v571_v11 = vmul.f32 -100.0, %v570_v15 }
 0x116   :  { %v580_v54 = vsel %vm579_vm1, %v571_v11, 0.0 }
 0x14d   :  { %v508_v33 = vpop.xlane.xlu1 %507  ;;  %v504_v39 = vpop.xlane.xlu0 %503 }
 0x14e   :  { %v514_v42 = vmul.f32 0.0078125, %v508_v33  ;;  %v509_v37 = vmul.f32 0.0078125, %v504_v39 }
 0x150   :  { %v518_v8 = vmul.f32 %v703_v40, %v514_v42  ;;  %v513_v27 = vmul.f32 %v705_v18, %v509_v37 }
 0x152   :  { %v615_v47 = vadd.f32 -3.0, %v518_v8  ;;  %v525_v41 = vand.u32 2147483647, %v513_v27 }
 0x154   :  { %v522_v51 = vand.u32 2147483647, %v615_v47  ;;  %v526_v24 = vmul.f32 0.03125, %v525_v41 }
 0x156   :  { %v523_v57 = vmul.f32 0.03125, %v522_v51 }
 0x158   :  { %v524_v61 = vadd.f32 %v523_v57, %v521_v32 }
 0x15a   :  { %v527_v10 = vadd.f32 %v526_v24, %v524_v61 }
 0x15c   :  { %v575_v53 = vsel %vm574_vm15, %v527_v10, 0.0 }
 0x15d   :  { %v578_v3 = vadd.f32 %v577_v46, %v575_v53 }
 0x15f   :  { %v581_v55 = vadd.f32 %v580_v54, %v578_v3 }
 0x161   :  { %582 = vst [vmem:[#allocation8 - $0x7] sm:$0x80] %v581_v55 }
 0x162   :  { %783 = shalt.err (!%p780_p0)
}
 0x163   :  { %s784_s13 = scalar_lea.hbm %s1098_s5, 16 }
 0x164   :  { %p785_p1 = scmp.ne.s32.totalorder %s1098_s5, %s784_s13  ;;  %p788_p2 = scmp.lt.u32.totalorder %s784_s13, %s1098_s5 }
 0x166   :  { %p790_p3 = pnand %p788_p2, %p785_p1 }
 0x168   :  { %793 = shalt.err (!%p790_p3)
}
 0x169   :  { %604 = dma.vmem_to_hbm [thread:$0]  %s602_s8, 16, %s1098_s5, [#allocation9]  }
 0x16a   :  { %798 = dma.done.wait [#allocation4], 4096  }
 0x16b   :  { %799 = vsyncadd [#allocation4], 4294963200 }
 0x16c   :  { %800 = dma.done.wait [#allocation9], 16  }
 0x16d   :  { %801 = vsyncadd [#allocation9], 4294967280 }
 0x16e   :  { %611 = vsyncpa [#allocation3], 1 }
 0x16f   :  { %612 = vsyncpa [#allocation6], 1 }
 0x170   :  { %613 = vsyncpa [#allocation4], 1 }
 0x171   :  { %614 = vsyncpa [#allocation9], 1 }

</bundles_post_ra>
